<compile_context>
chip_gen: v6e
topology: v6e:2x2x1
jax: 0.10.0
libtpu: 0.0.40
codegen_flags: <defaults>
</compile_context>

<pallas_src>
import functools

import jax
import jax.numpy as jnp
from jax.experimental import pallas as pl
from jax.experimental.pallas import tpu as pltpu


def _round_up(x: int, m: int) -> int:
    return ((x + m - 1) // m) * m


def _rmsnorm_kernel(x_ref, w_ref, o_ref, *, eps, true_h):
    # x_ref: (tm, Hp) input tile; w_ref: (1, Hp) resident weight; o_ref: (tm, Hp).
    x = x_ref[...].astype(jnp.float32)
    # Sum-of-squares divided by the *true* hidden size (not the padded width),
    # so lane padding with zeros is exact.
    variance = jnp.sum(x * x, axis=-1, keepdims=True) / float(true_h)
    normed = x * jax.lax.rsqrt(variance + eps)
    # Exact torch rounding: cast to the input dtype first, then multiply by the
    # weight in its own dtype — promotion mirrors `weight * x.to(input_dtype)`
    # (bf16*bf16 stays bf16; f32 weight promotes the product to f32).
    o_ref[...] = (w_ref[...] * normed.astype(x_ref.dtype)).astype(o_ref.dtype)


def _tpu_vmem_capacity() -> int:
    try:
        return int(pltpu.get_tpu_info().vmem_capacity_bytes)
    except Exception:
        return 64 << 20  # conservative (v7x per-TensorCore) fallback


def _choose_row_tile(rows: int, hidden_pad: int,
                     in_itemsize: int, out_itemsize: int):
    """Largest sublane-aligned row tile that fits VMEM, generation-aware."""
    vmem_cap = _tpu_vmem_capacity()
    # v7x exposes 64 MiB VMEM per TensorCore and shards the "parallel" grid
    # axis across 2 TCs; v5e/v6e expose 128 MiB on a single TC.
    two_cores = vmem_cap <= (64 << 20)

    sublane = max(8, 32 // in_itemsize)  # 8 for f32, 16 for bf16

    # Per tile row: double-buffered input + output tiles (own dtypes) plus
    # ~3 full-tile f32 temporaries kept live by the upcast -> square ->
    # normalize -> downcast chain.  Conservative so a tile that fits v6e's
    # 128 MiB never overshoots v7x's 64 MiB (no spill / VMEM OOM).
    per_row = hidden_pad * (2 * in_itemsize + 2 * out_itemsize + 3 * 4)

    # Tile budget: ~60% of VMEM (≈38 MiB on v7x, 64 MiB cap on v5e/v6e) so the
    # compiler's internal scratch and the resident weight keep headroom.
    budget = min(int(0.6 * vmem_cap), 64 << 20)
    tm_max = max(sublane, (budget // per_row) // sublane * sublane)

    # Minimum step count: 2 keeps the auto-pipeline double-buffered on a
    # single TensorCore; >=4 and even keeps both v7x TensorCores balanced.
    # No blanket >=8-step forcing — tiles are as large as VMEM allows.
    min_steps = 4 if two_cores else 2
    max_steps = pl.cdiv(rows, sublane)
    n = max(pl.cdiv(rows, tm_max), min(min_steps, max_steps))
    if two_cores and n > 1:
        n += n % 2  # even split across the two TensorCores
    tm = min(tm_max, max(sublane, _round_up(pl.cdiv(rows, n), sublane)))

    # Scoped-VMEM request: actual tile footprint + resident weight + headroom;
    # above v5e's 16 MiB default, well under physical capacity on every gen.
    vmem_bytes = tm * per_row + 4 * hidden_pad * 4 + (4 << 20)
    vmem_bytes = max(vmem_bytes, 32 << 20)
    vmem_bytes = min(vmem_bytes, min(int(0.7 * vmem_cap), 100 << 20))
    return tm, vmem_bytes


def moe_rmsnorm(hidden_states: jax.Array,
                weight: jax.Array,
                eps: float = 1e-6) -> jax.Array:
    """Pallas implementation of MoeRMSNorm.forward.

    hidden_states: (..., hidden_size)
    weight:        (hidden_size,)   (pass bf16 weight to keep a bf16 output)
    """
    orig_shape = hidden_states.shape
    hidden_size = orig_shape[-1]
    x2d = hidden_states.reshape(-1, hidden_size)
    rows = x2d.shape[0]

    # torch promotion of `weight * x.to(input_dtype)`
    out_dtype = jnp.promote_types(hidden_states.dtype, weight.dtype)

    # Lane-dense stores: pad the hidden axis to a multiple of 128 so every
    # store is an unmasked full-lane vst.  Typical MoE hidden sizes are
    # already multiples of 128, making this a no-op; otherwise the one-off
    # pad copy is traded against masked stores on every grid step.
    hidden_pad = _round_up(hidden_size, 128)
    w2d = weight.reshape(1, hidden_size)  # kept in its original dtype (resident)
    if hidden_pad != hidden_size:
        x2d = jnp.pad(x2d, ((0, 0), (0, hidden_pad - hidden_size)))
        w2d = jnp.pad(w2d, ((0, 0), (0, hidden_pad - hidden_size)))

    in_itemsize = jnp.dtype(hidden_states.dtype).itemsize
    out_itemsize = jnp.dtype(out_dtype).itemsize
    tm, vmem_bytes = _choose_row_tile(rows, hidden_pad, in_itemsize, out_itemsize)
    grid = (pl.cdiv(rows, tm),)

    kernel = functools.partial(_rmsnorm_kernel, eps=eps, true_h=hidden_size)

    # Block last dim equals the (padded) full hidden size, tm is a multiple of
    # the dtype's sublane count, so the (8, 128) BlockSpec constraint holds.
    # The partial last row-block (cdiv grid) is safe: the reduction is per-row
    # and the garbage padded rows are never read back.
    out2d = pl.pallas_call(
        kernel,
        out_shape=jax.ShapeDtypeStruct((rows, hidden_pad), out_dtype),
        grid_spec=pl.GridSpec(
            grid=grid,
            in_specs=[
                pl.BlockSpec((tm, hidden_pad), lambda i: (i, 0)),
                pl.BlockSpec((1, hidden_pad), lambda i: (0, 0)),
            ],
            out_specs=pl.BlockSpec((tm, hidden_pad), lambda i: (i, 0)),
        ),
        compiler_params=pltpu.CompilerParams(
            dimension_semantics=("parallel",),
            vmem_limit_bytes=vmem_bytes),
    )(x2d, w2d)

    if hidden_pad != hidden_size:
        out2d = out2d[:, :hidden_size]
    return out2d.reshape(orig_shape[:-1] + (hidden_size,))


def moe_rmsnorm_ref(hidden_states, weight, eps=1e-6):
    """Pure-JAX reference matching the PyTorch forward exactly."""
    input_dtype = hidden_states.dtype
    x = hidden_states.astype(jnp.float32)
    variance = jnp.mean(x * x, axis=-1, keepdims=True)
    x = x * jax.lax.rsqrt(variance + eps)
    return weight * x.astype(input_dtype)


if __name__ == "__main__":
    key = jax.random.PRNGKey(0)
    batch, seq, hidden = 2, 8, 128

    x = jax.random.normal(key, (batch, seq, hidden), dtype=jnp.float32)
    # nn.Parameter(torch.ones(hidden_size)) -> deterministic ones init (f32)
    weight = jnp.ones((hidden,), dtype=jnp.float32)

    out = jax.block_until_ready(moe_rmsnorm(x, weight, eps=1e-6))
    ref = moe_rmsnorm_ref(x, weight, eps=1e-6)
    assert out.shape == x.shape, (out.shape, x.shape)
    assert out.dtype == ref.dtype, (out.dtype, ref.dtype)
    assert jnp.allclose(out, ref, atol=1e-5, rtol=1e-5), "f32 mismatch vs reference"

    # bf16 activations, f32 weight (torch-style promotion to f32 output)
    x_bf16 = x.astype(jnp.bfloat16)
    out_bf16 = jax.block_until_ready(moe_rmsnorm(x_bf16, weight, eps=1e-6))
    ref_bf16 = moe_rmsnorm_ref(x_bf16, weight, eps=1e-6)
    assert out_bf16.dtype == ref_bf16.dtype
    assert jnp.allclose(out_bf16, ref_bf16, atol=2e-2, rtol=2e-2), "bf16/f32 mismatch"

    # bf16 weight too: output stays bf16 (2B reads + 2B writes -> ~1.5x faster)
    w_bf16 = weight.astype(jnp.bfloat16)
    out_bb = jax.block_until_ready(moe_rmsnorm(x_bf16, w_bf16, eps=1e-6))
    ref_bb = moe_rmsnorm_ref(x_bf16, w_bf16, eps=1e-6)
    assert out_bb.dtype == jnp.bfloat16 and out_bb.dtype == ref_bb.dtype
    assert jnp.allclose(out_bb.astype(jnp.float32), ref_bb.astype(jnp.float32),
                        atol=2e-2, rtol=2e-2), "bf16/bf16 mismatch"

    # Non-128-multiple hidden size exercises the lane-padding path.
    hidden2 = 96
    x2 = jax.random.normal(jax.random.PRNGKey(1), (4, 8, hidden2), jnp.float32)
    w2 = jnp.ones((hidden2,), dtype=jnp.float32)
    out2 = jax.block_until_ready(moe_rmsnorm(x2, w2, eps=1e-6))
    ref2 = moe_rmsnorm_ref(x2, w2, eps=1e-6)
    assert out2.shape == x2.shape
    assert jnp.allclose(out2, ref2, atol=1e-5, rtol=1e-5), "padded-hidden mismatch"

    print("KERNEL_OK")
</pallas_src>

<mosaic_0001>
module attributes {stable_mosaic.version = 11 : i64} {
  func.func @_rmsnorm_kernel(%arg0: i32, %arg1: memref<8x128xf32, #tpu.memory_space<vmem>>, %arg2: memref<1x128xf32, #tpu.memory_space<vmem>>, %arg3: memref<8x128xf32, #tpu.memory_space<vmem>>) attributes {dimension_semantics = [#tpu.dimension_semantics<parallel>], iteration_bounds = array<i64: 2>, scalar_prefetch = 0 : i64, scratch_operands = 0 : i64, tpu.core_type = #tpu.core_type<tc>, window_params = [{transform_indices = @transform_0, window_bounds = array<i64: 8, 128>}, {pipeline_mode = #tpu.pipeline_mode<synchronous>, transform_indices = @transform_1, window_bounds = array<i64: 1, 128>}, {transform_indices = @transform_2, window_bounds = array<i64: 8, 128>}]} {
    %c0 = arith.constant 0 : index
    %c0_0 = arith.constant 0 : index
    %0 = vector.load %arg1[%c0, %c0_0] : memref<8x128xf32, #tpu.memory_space<vmem>>, vector<8x128xf32>
    %1 = arith.mulf %0, %0 : vector<8x128xf32>
    %cst = arith.constant dense<0.000000e+00> : vector<8xf32>
    %2 = vector.multi_reduction <add>, %1, %cst [1] : vector<8x128xf32> to vector<8xf32>
    %3 = vector.shape_cast %2 : vector<8xf32> to vector<8x1xf32>
    %cst_1 = arith.constant 1.280000e+02 : f32
    %4 = vector.broadcast %cst_1 : f32 to vector<8x1xf32>
    %5 = arith.divf %3, %4 : vector<8x1xf32>
    %cst_2 = arith.constant 9.99999997E-7 : f32
    %6 = vector.broadcast %cst_2 : f32 to vector<8x1xf32>
    %7 = arith.addf %5, %6 : vector<8x1xf32>
    %8 = math.rsqrt %7 : vector<8x1xf32>
    %9 = vector.broadcast %8 : vector<8x1xf32> to vector<8x128xf32>
    %10 = arith.mulf %0, %9 : vector<8x128xf32>
    %c0_3 = arith.constant 0 : index
    %c0_4 = arith.constant 0 : index
    %11 = vector.load %arg2[%c0_3, %c0_4] : memref<1x128xf32, #tpu.memory_space<vmem>>, vector<1x128xf32>
    %12 = vector.broadcast %11 : vector<1x128xf32> to vector<8x128xf32>
    %13 = arith.mulf %12, %10 : vector<8x128xf32>
    %c0_5 = arith.constant 0 : index
    %c0_6 = arith.constant 0 : index
    %14 = vector.load %arg3[%c0_5, %c0_6] : memref<8x128xf32, #tpu.memory_space<vmem>>, vector<8x128xf32>
    tpu.vector_store %arg3[%c0_5, %c0_6], %13 {strides = array<i32>} : memref<8x128xf32, #tpu.memory_space<vmem>>, vector<8x128xf32>,
    return
  }
  func.func @transform_0(%arg0: i32) -> (i32, i32) {
    %c0_i32 = arith.constant 0 : i32
    %c0_i32_0 = arith.constant 0 : i32
    return %arg0, %c0_i32 : i32, i32
  }
  func.func @transform_1(%arg0: i32) -> (i32, i32) {
    %c0_i32 = arith.constant 0 : i32
    %c0_i32_0 = arith.constant 0 : i32
    %c0_i32_1 = arith.constant 0 : i32
    return %c0_i32, %c0_i32_0 : i32, i32
  }
  func.func @transform_2(%arg0: i32) -> (i32, i32) {
    %c0_i32 = arith.constant 0 : i32
    %c0_i32_0 = arith.constant 0 : i32
    return %arg0, %c0_i32 : i32, i32
  }
}

</mosaic_0001>

<bundles_post_ra>
// kernel: tpu_custom_call.1
= control target key start
LH: loop header
LB: loop body
LE: loop exit
PB: predicated region body
PF: predicated region fallthrough
CT: control target
= control target key end

     0   :  { %7 = vsyncpa [#allocation3], 0  ;;  %s577_s0 = inlined_call_operand.hbm [shape: f32[16,128], index: 0, kind: input, shape index: {}]   ;;  %s578_s1 = inlined_call_operand.vmem [shape: f32[1,128], index: 1, kind: input, shape index: {}]   ;;  %s579_s2 = inlined_call_operand.hbm [shape: f32[16,128], index: 2, kind: output, shape index: {}]  }
   0x1   :  { %9 = vsyncpa [#allocation3 + $0x1], 0 }
   0x2   :  { %10 = vsyncpa [#allocation4], 0 }
   0x3   :  { %12 = vsyncpa [#allocation4 + $0x1], 0  ;;  %s433_s9 = smov 0   ;;  %s435_s10 = smov 0  }
   0x4   :  { %s437_s11 = smov 0   ;;  %s439_s12 = smov 0  }
   0x5 LB: > { %s454_s13 = sadd.s32 4294967295, %s414_s12   ;;  %s261_s14 = sadd.s32 4294967294, %s414_s12   ;;  %s414_s12 = sphi %s439_s12, %s596_s12   ;;  %s410_s11 = sphi %s437_s11, %s595_s11   ;;  %s406_s10 = sphi %s435_s10, %s594_s10   ;;  %s402_s9 = sphi %s433_s9, %s593_s9  }
   0x6   : > { %s458_s15 = sadd.s32 1, %s414_s12   ;;  %s25_s16 = sadd.s32 1, %s410_s11 }
   0x7   : > { %s22_s17 = ssub.s32 %s414_s12, %s458_s15  ;;  %p32_p0 = scmp.ne.s32.totalorder %s410_s11, %s406_s10 }
   0x8   : > { %p23_p1 = scmp.eq.s32.totalorder %s22_s17, 0  ;;  %p33_p2 = scmp.eq.s32.totalorder %s414_s12, 0 }
   0x9   : > { %p38_p3 = scmp.ne.s32.totalorder %s406_s10, %s402_s9  ;;  %p39_p4 = scmp.eq.s32.totalorder %s454_s13, 0 }
   0xa   : > { %s470_s18 = scalar_select %p23_p1, %s410_s11, %s25_s16  }
   0xb   : > { %p472_p5 = por %p33_p2, %p32_p0  ;;  %p476_p6 = por %p39_p4, %p38_p3 }
   0xc   : > { %p83_p7 = scmp.eq.s32.totalorder %s454_s13, 1  ;;  %p89_p8 = scmp.eq.s32.totalorder %s261_s14, 1 }
   0xd   : > { %s583_s20 = scalar_select %p476_p6, 1, 0 }
   0xe   : > { %p286_p10 = scmp.lt.s32.totalorder %s414_s12, 2  ;;  %p483_p11 = por %p83_p7, %p32_p0 }
   0xf   : > { %p487_p12 = por %p89_p8, %p38_p3  ;;  %s112_s23 = sand.u32 1, %s410_s11  }
  0x10   : > { %s584_s21 = scalar_select %p483_p11, 1, 0 }
  0x11   : > { %s585_s22 = scalar_select %p487_p12, 1, 0 }
  0x12   : > { %s265_s24 = sshll.u32 %s414_s12, 7  ;;  %s264_s25 = sshll.u32 %s112_s23, 3 }
  0x13   : > { %s496_s28 = scalar_lea.hbm %s577_s0, %s265_s24  ;;  %s116_s29 = scalar_lea.vmem [#allocation2], %s264_s25 }
  0x14   : > { %s123_s30 = sshll.u32 %s116_s29, 4  ;;  %p500_p13 = pnand %p286_p10, %p472_p5  ;;  %s504_s30 = int_to_ptr.vmem [resolvable:$true] %s123_s30 }
  0x15   : > { %s113_s4 = scalar_lea.sflag [#allocation3], %s112_s23  ;;  %s322_s5 = scalar_lea.hbm %s496_s28, 128 }
  0x16   : > { %p323_p2 = scmp.ne.s32.totalorder %s496_s28, %s322_s5  ;;  %p324_p3 = pneg %p500_p13 }
  0x17   : > { %s327_s8 = scalar_lea.hbm %s577_s0, 256  ;;  %p328_p5 = scmp.lt.s32.totalorder %s496_s28, %s577_s0 }
  0x18   : > { %p325_p4 = pnand %p324_p3, %p323_p2  ;;  %p329_p8 = scmp.lt.s32.totalorder %s327_s8, %s322_s5 }
  0x1a   : > { %p326_p7 = pneg %p325_p4  ;;  %p330_p10 = por %p329_p8, %p328_p5 }
  0x1c   : > { %p331_p9 = pnand %p330_p10, %p326_p7 }
  0x1e   : > { %334 = shalt.err (!%p331_p9)
}
  0x1f   : > { %s335_s17 = scalar_lea.vmem %s504_s30, 128  ;;  %s416_s19 = smov [#allocation2]  }
  0x20   : > { %p336_p0 = scmp.ne.s32.totalorder %s504_s30, %s335_s17  ;;  %s340_s23 = sshll.u32 %s416_s19, 4  ;;  %s341_s23 = int_to_ptr.vmem [resolvable:$false] %s340_s23 }
  0x21   : > { %s342_s24 = scalar_lea.vmem %s341_s23, 256  ;;  %p343_p4 = scmp.lt.s32.totalorder %s504_s30, %s341_s23 }
  0x22   : > { %p338_p1 = pnand %p336_p0, %p324_p3  ;;  %p344_p12 = scmp.lt.s32.totalorder %s342_s24, %s335_s17 }
  0x24   : > { %p339_p2 = pneg %p338_p1  ;;  %p345_p11 = por %p344_p12, %p343_p4 }
  0x26   : > { %p346_p6 = pnand %p345_p11, %p339_p2 }
  0x28   : > { %349 = shalt.err (!%p346_p6)
}
  0x29   : > { %281 = dma.hbm_to_vmem [thread:$0]  (!%p500_p13), %s496_s28, 128, %s504_s30, %s113_s4  }
  0x2a   : > { %p587_p9 = scmp.lt.s32.totalorder %s414_s12, 3  ;;  %p588_p7 = scmp.ge.s32.totalorder %s414_s12, 1 }
  0x2c   : > { %p129_p0 = pnand %p588_p7, %p587_p9 }
  0x2d   : > { %s531_s25 = sand.u32 (!%p129_p0), 1, %s406_s10   ;;  %p589_p6 = scmp.ne.s32.totalorder (!%p129_p0), %s583_s20, 0 }
  0x2e   : > { %132 = sbr.rel (%p129_p0) target bundleno = 228 (0xe4), region = 28  ;;  %s267_s26 = sshll.u32 (!%p129_p0), %s531_s25, 3 }
  0x2f   : > { %s135_s27 = scalar_lea.sflag (!%p129_p0), [#allocation3], %s531_s25  ;;  %s138_s29 = scalar_lea.vmem (!%p129_p0), [#allocation2], %s267_s26 }
  0x33   : > { %393 = dma.done.wait (%p589_p6), %s135_s27, 128  }
  0x34   : > { %395 = vsyncadd (%p589_p6), %s135_s27, 4294967168  ;;  %v159_v0 = vld [vmem:[%s138_s29] sm:$0xff]  ;;  %s271_s3 = sshll.u32 %s454_s13, 7  ;;  %s158_s4 = scalar_lea.vmem [#allocation5], %s267_s26 }
  0x35   : > { %v160_v1 = vmul.f32 %v159_v0, %v159_v0  ;;  %v269_v6 = vld [vmem:[%s578_s1] ss:$0 sm:$0xff]  ;;  %s191_s5 = sshll.u32 %s158_s4, 4  ;;  %s189_s7 = scalar_lea.hbm %s579_s2, %s271_s3  ;;  %s192_s5 = int_to_ptr.vmem [resolvable:$true] %s191_s5 }
  0x36   : > { %s178_s8 = scalar_lea.sflag [#allocation4], %s531_s25  ;;  %s350_s14 = scalar_lea.vmem %s192_s5, 128 }
  0x37   : > { %161 = vadd.xlane.f32.xlu0 %v160_v1  ;;  %p351_p11 = scmp.ne.s32.totalorder %s192_s5, %s350_s14  ;;  %p590_p12 = scmp.ne.s32.totalorder %s584_s21, 0 }
  0x38   : > { %s417_s16 = smov [#allocation5]  }
  0x39   : > { %p352_p13 = pnand %p351_p11, %p590_p12  ;;  %s354_s17 = sshll.u32 %s417_s16, 4  ;;  %s355_s17 = int_to_ptr.vmem [resolvable:$false] %s354_s17 }
  0x3a   : > { %s356_s13 = scalar_lea.vmem %s355_s17, 256  ;;  %p357_p3 = scmp.lt.s32.totalorder %s192_s5, %s355_s17 }
  0x3b   : > { %p353_p1 = pneg %p352_p13  ;;  %p358_p5 = scmp.lt.s32.totalorder %s356_s13, %s350_s14 }
  0x3d   : > { %p359_p8 = por %p358_p5, %p357_p3 }
  0x3f   : > { %p360_p10 = pnand %p359_p8, %p353_p1 }
  0xc0   : > { %v162_v2 = vpop.xlane.xlu0 %161 }
  0xc1   : > { %v164_v3 = vmul.f32 0.0078125, %v162_v2 }
  0xc3   : > { %v165_v4 = vadd.f32 1e-06, %v164_v3 }
  0xc5   : > { %320 = vrsqrt.f32 %v165_v4 }
  0xd2   : > { %v321_v5 = vpop.eup %320 }
  0xd3   : > { %v167_v7 = vmul.f32 %v321_v5, %v159_v0 }
  0xd5   : > { %v175_v8 = vmul.f32 %v269_v6, %v167_v7 }
  0xd7   : > { %176 = vst [vmem:[%s158_s4] sm:$0xff] %v175_v8 }
  0xd8   : > { %363 = shalt.err (!%p360_p10)
}
  0xd9   : > { %s364_s19 = scalar_lea.hbm %s189_s7, 128  ;;  %s368_s25 = scalar_lea.hbm %s579_s2, 256 }
  0xda   : > { %p365_p2 = scmp.ne.s32.totalorder %s189_s7, %s364_s19  ;;  %p369_p7 = scmp.lt.s32.totalorder %s189_s7, %s579_s2 }
  0xdb   : > { %p370_p0 = scmp.lt.s32.totalorder %s368_s25, %s364_s19 }
  0xdc   : > { %p366_p4 = pnand %p365_p2, %p590_p12 }
  0xdd   : > { %p371_p6 = por %p370_p0, %p369_p7 }
  0xde   : > { %p367_p9 = pneg %p366_p4 }
  0xe0   : > { %p372_p11 = pnand %p371_p6, %p367_p9 }
  0xe2   : > { %375 = shalt.err (!%p372_p11)
}
  0xe3   : > { %276 = dma.vmem_to_hbm [thread:$0]  (%p590_p12), %s192_s5, 128, %s189_s7, %s178_s8  }
  0xe4 PF: > { %s203_s29 = sand.u32 1, %s402_s9   ;;  %p591_p13 = scmp.ne.s32.totalorder %s585_s22, 0 }
  0xe5   : > { %p592_p1 = scmp.ge.s32.totalorder %s414_s12, 2  ;;  %s204_s28 = scalar_lea.sflag [#allocation4], %s203_s29 }
  0xe7   : > { %p283_p3 = pnand %p592_p1, %p591_p13 }
  0xe9   : > { %p284_p5 = pneg %p283_p3 }
  0xeb   : > { %397 = dma.done.wait (%p284_p5), %s204_s28, 128  }
  0xec   : > { %399 = vsyncadd (%p284_p5), %s204_s28, 4294967168  ;;  %p15_p8 = scmp.ge.s32.totalorder %s458_s15, 4   ;;  %s593_s9 = smov %s406_s10 }
  0xed   : > { %s594_s10 = smov %s410_s11  ;;  %s595_s11 = smov %s470_s18 }
  0xee   : > { %s596_s12 = smov %s458_s15  ;;  %17 = sbr.rel (!%p15_p8) target bundleno = 5 (0x5), region = 73 }
  0xf3   :  { %209 = vsyncpa [#allocation3], 1 }
  0xf4   :  { %211 = vsyncpa [#allocation3 + $0x1], 1 }
  0xf5   :  { %212 = vsyncpa [#allocation4], 1 }
  0xf6   :  { %214 = vsyncpa [#allocation4 + $0x1], 1 }

</bundles_post_ra>
